<compile_context>
chip_gen: v5e
topology: v5e:2x2
jax: 0.10.0
libtpu: 0.0.40
codegen_flags: <defaults>
</compile_context>

<pallas_src>
import numpy as np
import jax
import jax.numpy as jnp
from jax.experimental import pallas as pl
from jax.experimental.pallas import tpu as pltpu

_LANES = 128
_SUBLANES = 8
_INT32_MAX = 2147483647
_INT32_MIN = -2147483648


def _ssimae_kernel(pred_ref, gt_ref, mask_ref, num_ref, den_ref):
    """One grid step handles T (b, c) rows, each laid out as (R, 128)."""
    p = pred_ref[...]          # (T, R, 128) f32
    g = gt_ref[...]            # (T, R, 128) f32
    m = mask_ref[...]          # (T, R, 128) f32 in {0, 1} (padding = 0)
    T = p.shape[0]

    n_valid = jnp.sum(m, axis=(1, 2), keepdims=True)               # (T, 1, 1)
    # torch.nanmedian picks the lower of the two middle values for even
    # counts: 0-based rank k = (n - 1) // 2; we search for the smallest key
    # with count(valid keys <= key) >= k + 1.
    kp1 = jnp.floor((n_valid - 1.0) * 0.5) + 1.0                    # (T, 1, 1)

    imax = jnp.int32(_INT32_MAX)

    def to_key(x):
        # Monotonic int32 key: signed-int order of keys == float order of x.
        b = pltpu.bitcast(x, jnp.int32)                             # (T, R, 128)
        key = jnp.where(b >= 0, b, b ^ imax)
        # Pre-mask once: invalid entries -> INT32_MAX so they are never
        # counted (the floor-midpoint never reaches INT32_MAX pre-convergence).
        return jnp.where(m > 0.0, key, imax)

    def decode_key(k):
        # The key map is an involution; decode the converged key directly
        # instead of an O(N) recovery pass.
        b = jnp.where(k >= 0, k, k ^ imax)
        return pltpu.bitcast(b, jnp.float32)

    key_p = to_key(p)
    key_g = to_key(g)

    lo0 = jnp.full((T, 1, 1), _INT32_MIN, dtype=jnp.int32)
    hi0 = jnp.full((T, 1, 1), _INT32_MAX, dtype=jnp.int32)

    def body(_, carry):
        lo_p, hi_p, lo_g, hi_g = carry
        # overflow-free floor((lo + hi) / 2) for signed int32
        mid_p = (lo_p & hi_p) + ((lo_p ^ hi_p) >> 1)
        mid_g = (lo_g & hi_g) + ((lo_g ^ hi_g) >> 1)
        cnt_p = jnp.sum(jnp.where(key_p <= mid_p, 1.0, 0.0),
                        axis=(1, 2), keepdims=True)                 # (T, 1, 1)
        cnt_g = jnp.sum(jnp.where(key_g <= mid_g, 1.0, 0.0),
                        axis=(1, 2), keepdims=True)
        go_p = cnt_p >= kp1
        go_g = cnt_g >= kp1
        hi_p = jnp.where(go_p, mid_p, hi_p)
        lo_p = jnp.where(go_p, lo_p, mid_p + 1)
        hi_g = jnp.where(go_g, mid_g, hi_g)
        lo_g = jnp.where(go_g, lo_g, mid_g + 1)
        return lo_p, hi_p, lo_g, hi_g

    # Two fused bisections: 32 halvings of a 2^32 range guarantee lo == hi.
    _, med_p, _, med_g = jax.lax.fori_loop(0, 32, body, (lo0, hi0, lo0, hi0))

    has_valid = n_valid > 0.0
    t_p = jnp.where(has_valid, decode_key(med_p), 0.0)              # (T, 1, 1)
    t_g = jnp.where(has_valid, decode_key(med_g), 0.0)

    s_p = jnp.sum(jnp.abs(p - t_p) * m, axis=(1, 2), keepdims=True) / (n_valid + 1.0)
    s_g = jnp.sum(jnp.abs(g - t_g) * m, axis=(1, 2), keepdims=True) / (n_valid + 1.0)
    inv_sp = 1.0 / (s_p + 1e-6)                                     # per-row scalar
    inv_sg = 1.0 / (s_g + 1e-6)

    # Fused final pass: aligned arrays are never materialized.
    num = jnp.sum(jnp.abs((p - t_p) * inv_sp - (g - t_g) * inv_sg) * m,
                  axis=(1, 2), keepdims=True)                        # (T, 1, 1)

    # Lane-dense stores: broadcast each per-row scalar across 128 lanes.
    num_ref[...] = jnp.broadcast_to(num.reshape(1, T, 1), (1, T, _LANES))
    den_ref[...] = jnp.broadcast_to(n_valid.reshape(1, T, 1), (1, T, _LANES))


def ssimae_loss(depth_preds, depth_gt, mask_valid, *, rows_per_step=8):
    """depth_preds, depth_gt: (B, C, H, W) float; mask_valid: (B, C, H, W) bool."""
    B, C, H, W = depth_preds.shape
    BC, N = B * C, H * W

    # Pad the pixel axis so each (b, c) row is a dense (R_pad, 128) tile
    # (padding carries mask = 0, value = 0 and is therefore ignored).
    n_lane = pl.cdiv(N, _LANES)
    R_pad = pl.cdiv(n_lane, _SUBLANES) * _SUBLANES
    Np = R_pad * _LANES
    row_bytes = R_pad * _LANES * 4

    # Adaptive rows-per-step:
    #  * t_vmem : keep ~(6 pipelined input buffers + ~6 live pass-sized temps)
    #             under a 32 MiB budget -> fits default scoped limits and
    #             leaves headroom on v7x's 64 MiB physical VMEM.
    #  * t_split: keep the grid length >= 2 when BC >= 2 (v7x: both cores busy)
    #             and never burn bisection work on fully-padded rows.
    t_vmem = max(1, (32 << 20) // (row_bytes * 12))
    t_split = pl.cdiv(BC, 2) if BC >= 2 else 1
    T = int(max(1, min(rows_per_step, t_vmem, t_split, BC)))
    BC_pad = pl.cdiv(BC, T) * T
    G = BC_pad // T

    def prep(x):
        x = x.astype(jnp.float32).reshape(BC, N)
        x = jnp.pad(x, ((0, BC_pad - BC), (0, Np - N)))
        return x.reshape(BC_pad, R_pad, _LANES)

    p = prep(depth_preds)
    g = prep(depth_gt)
    m = prep(mask_valid)

    # Explicit VMEM limit: v5e's default scoped limit is 16 MiB, v6e/v7x 32 MiB;
    # stay <= 56 MiB so v7x's 64 MiB physical VMEM keeps headroom.
    vmem_need = row_bytes * T * 14 + 4 * 2 * T * _LANES * 4 + (1 << 20)
    vmem_limit = int(min(56 << 20, max(vmem_need, 32 << 20)))

    out_num, out_den = pl.pallas_call(
        _ssimae_kernel,
        out_shape=(
            jax.ShapeDtypeStruct((G, T, _LANES), jnp.float32),
            jax.ShapeDtypeStruct((G, T, _LANES), jnp.float32),
        ),
        grid_spec=pltpu.PrefetchScalarGridSpec(
            num_scalar_prefetch=0,
            grid=(G,),
            in_specs=[
                pl.BlockSpec((T, R_pad, _LANES), lambda i: (i, 0, 0)),
                pl.BlockSpec((T, R_pad, _LANES), lambda i: (i, 0, 0)),
                pl.BlockSpec((T, R_pad, _LANES), lambda i: (i, 0, 0)),
            ],
            out_specs=[
                pl.BlockSpec((1, T, _LANES), lambda i: (i, 0, 0)),
                pl.BlockSpec((1, T, _LANES), lambda i: (i, 0, 0)),
            ],
        ),
        compiler_params=pltpu.CompilerParams(
            dimension_semantics=("parallel",),
            vmem_limit_bytes=vmem_limit),
        cost_estimate=pl.CostEstimate(
            flops=int(230 * BC_pad * Np),           # 32 fused bisection passes + align
            transcendentals=0,
            bytes_accessed=int(3 * BC_pad * Np * 4 + 2 * BC_pad * _LANES * 4)),
    )(p, g, m)

    num_total = jnp.sum(out_num.reshape(BC_pad, _LANES)[:BC, 0])
    den_total = jnp.sum(out_den.reshape(BC_pad, _LANES)[:BC, 0])
    return num_total / den_total


def _reference_ssimae(pred, gt, mask):
    """Pure-numpy reference matching the PyTorch module (lower-median)."""
    B, C, H, W = pred.shape
    BC, N = B * C, H * W
    p = np.asarray(pred, np.float32).reshape(BC, N)
    g = np.asarray(gt, np.float32).reshape(BC, N)
    m = np.asarray(mask).reshape(BC, N).astype(np.float32)

    def align(x):
        n = m.sum(-1, keepdims=True)
        xs = np.where(m > 0, x, np.inf)
        xs_sorted = np.sort(xs, axis=-1)
        k = np.maximum((n - 1) // 2, 0).astype(np.int64)
        med = np.take_along_axis(xs_sorted, k, axis=-1)
        t = np.where(n > 0, med, 0.0)
        diff = np.abs(x - t) * m
        s = diff.sum(-1, keepdims=True) / (n + 1.0)
        return (x - t) / (s + 1e-6)

    pa, ga = align(p), align(g)
    return float((np.abs(pa - ga) * m).sum() / m.sum())


if __name__ == "__main__":
    key = jax.random.PRNGKey(0)
    k1, k2, k3, k4, k5, k6 = jax.random.split(key, 6)

    # Case 1: small square depth maps (single channel).
    B, C, H, W = 2, 1, 16, 16
    depth_preds = jax.random.uniform(k1, (B, C, H, W), jnp.float32, 0.1, 10.0)
    depth_gt = jax.random.uniform(k2, (B, C, H, W), jnp.float32, 0.1, 10.0)
    mask_valid = jax.random.uniform(k3, (B, C, H, W), jnp.float32) > 0.3

    loss = jax.block_until_ready(ssimae_loss(depth_preds, depth_gt, mask_valid))
    ref = _reference_ssimae(np.asarray(depth_preds), np.asarray(depth_gt),
                            np.asarray(mask_valid))
    assert np.allclose(float(loss), ref, rtol=1e-4, atol=1e-5), (float(loss), ref)

    # Case 2: odd spatial size / multi-channel (exercises pixel + row padding)
    # with one fully-invalid slice (exercises the empty-mask guard).
    B2, C2, H2, W2 = 2, 3, 13, 19
    dp2 = jax.random.uniform(k4, (B2, C2, H2, W2), jnp.float32, 0.1, 10.0)
    dg2 = jax.random.uniform(k5, (B2, C2, H2, W2), jnp.float32, 0.1, 10.0)
    mv2 = jax.random.uniform(k6, (B2, C2, H2, W2), jnp.float32) > 0.3
    mv2 = mv2.at[1, 2].set(False)

    loss2 = jax.block_until_ready(ssimae_loss(dp2, dg2, mv2))
    ref2 = _reference_ssimae(np.asarray(dp2), np.asarray(dg2), np.asarray(mv2))
    assert np.allclose(float(loss2), ref2, rtol=1e-4, atol=1e-5), (float(loss2), ref2)

    print("KERNEL_OK")
</pallas_src>

<mosaic_0001>
module attributes {stable_mosaic.version = 11 : i64} {
  func.func @_ssimae_kernel(%arg0: i32, %arg1: memref<1x8x128xf32, #tpu.memory_space<vmem>>, %arg2: memref<1x8x128xf32, #tpu.memory_space<vmem>>, %arg3: memref<1x8x128xf32, #tpu.memory_space<vmem>>, %arg4: memref<1x1x128xf32, #tpu.memory_space<vmem>>, %arg5: memref<1x1x128xf32, #tpu.memory_space<vmem>>) attributes {dimension_semantics = [#tpu.dimension_semantics<parallel>], iteration_bounds = array<i64: 2>, scalar_prefetch = 0 : i64, scratch_operands = 0 : i64, tpu.core_type = #tpu.core_type<tc>, window_params = [{transform_indices = @transform_0, window_bounds = array<i64: 1, 8, 128>}, {transform_indices = @transform_1, window_bounds = array<i64: 1, 8, 128>}, {transform_indices = @transform_2, window_bounds = array<i64: 1, 8, 128>}, {transform_indices = @transform_3, window_bounds = array<i64: 1, 1, 128>}, {transform_indices = @transform_4, window_bounds = array<i64: 1, 1, 128>}]} {
    %c0 = arith.constant 0 : index
    %c0_0 = arith.constant 0 : index
    %c0_1 = arith.constant 0 : index
    %0 = vector.load %arg1[%c0, %c0_0, %c0_1] : memref<1x8x128xf32, #tpu.memory_space<vmem>>, vector<1x8x128xf32>
    %c0_2 = arith.constant 0 : index
    %c0_3 = arith.constant 0 : index
    %c0_4 = arith.constant 0 : index
    %1 = vector.load %arg2[%c0_2, %c0_3, %c0_4] : memref<1x8x128xf32, #tpu.memory_space<vmem>>, vector<1x8x128xf32>
    %c0_5 = arith.constant 0 : index
    %c0_6 = arith.constant 0 : index
    %c0_7 = arith.constant 0 : index
    %2 = vector.load %arg3[%c0_5, %c0_6, %c0_7] : memref<1x8x128xf32, #tpu.memory_space<vmem>>, vector<1x8x128xf32>
    %cst = arith.constant dense<0.000000e+00> : vector<1xf32>
    %3 = vector.multi_reduction <add>, %2, %cst [1, 2] : vector<1x8x128xf32> to vector<1xf32>
    %4 = vector.shape_cast %3 : vector<1xf32> to vector<1x1x1xf32>
    %cst_8 = arith.constant 1.000000e+00 : f32
    %5 = vector.broadcast %cst_8 : f32 to vector<1x1x1xf32>
    %6 = arith.subf %4, %5 : vector<1x1x1xf32>
    %cst_9 = arith.constant 5.000000e-01 : f32
    %7 = vector.broadcast %cst_9 : f32 to vector<1x1x1xf32>
    %8 = arith.mulf %6, %7 : vector<1x1x1xf32>
    %9 = math.floor %8 : vector<1x1x1xf32>
    %cst_10 = arith.constant 1.000000e+00 : f32
    %10 = vector.broadcast %cst_10 : f32 to vector<1x1x1xf32>
    %11 = arith.addf %9, %10 : vector<1x1x1xf32>
    %12 = tpu.bitcast %0 : vector<1x8x128xf32> -> vector<1x8x128xi32>
    %c0_i32 = arith.constant 0 : i32
    %13 = vector.broadcast %c0_i32 : i32 to vector<1x8x128xi32>
    %14 = arith.cmpi sge, %12, %13 : vector<1x8x128xi32>
    %c2147483647_i32 = arith.constant 2147483647 : i32
    %15 = vector.broadcast %c2147483647_i32 : i32 to vector<1x8x128xi32>
    %16 = arith.xori %12, %15 : vector<1x8x128xi32>
    %17 = arith.select %14, %12, %16 : vector<1x8x128xi1>, vector<1x8x128xi32>
    %cst_11 = arith.constant 0.000000e+00 : f32
    %18 = vector.broadcast %cst_11 : f32 to vector<1x8x128xf32>
    %19 = arith.cmpf ogt, %2, %18 : vector<1x8x128xf32>
    %c2147483647_i32_12 = arith.constant 2147483647 : i32
    %20 = vector.broadcast %c2147483647_i32_12 : i32 to vector<1x8x128xi32>
    %21 = arith.select %19, %17, %20 : vector<1x8x128xi1>, vector<1x8x128xi32>
    %22 = tpu.bitcast %1 : vector<1x8x128xf32> -> vector<1x8x128xi32>
    %c0_i32_13 = arith.constant 0 : i32
    %23 = vector.broadcast %c0_i32_13 : i32 to vector<1x8x128xi32>
    %24 = arith.cmpi sge, %22, %23 : vector<1x8x128xi32>
    %c2147483647_i32_14 = arith.constant 2147483647 : i32
    %25 = vector.broadcast %c2147483647_i32_14 : i32 to vector<1x8x128xi32>
    %26 = arith.xori %22, %25 : vector<1x8x128xi32>
    %27 = arith.select %24, %22, %26 : vector<1x8x128xi1>, vector<1x8x128xi32>
    %cst_15 = arith.constant 0.000000e+00 : f32
    %28 = vector.broadcast %cst_15 : f32 to vector<1x8x128xf32>
    %29 = arith.cmpf ogt, %2, %28 : vector<1x8x128xf32>
    %c2147483647_i32_16 = arith.constant 2147483647 : i32
    %30 = vector.broadcast %c2147483647_i32_16 : i32 to vector<1x8x128xi32>
    %31 = arith.select %29, %27, %30 : vector<1x8x128xi1>, vector<1x8x128xi32>
    %c-2147483648_i32 = arith.constant -2147483648 : i32
    %32 = vector.broadcast %c-2147483648_i32 : i32 to vector<1x1x1xi32>
    %c2147483647_i32_17 = arith.constant 2147483647 : i32
    %33 = vector.broadcast %c2147483647_i32_17 : i32 to vector<1x1x1xi32>
    %c0_i32_18 = arith.constant 0 : i32
    %c32_i32 = arith.constant 32 : i32
    %34 = arith.addi %c0_i32_18, %c32_i32 : i32
    %c1_i32 = arith.constant 1 : i32
    %35:4 = scf.for %arg6 = %c0_i32_18 to %34 step %c1_i32 iter_args(%arg7 = %32, %arg8 = %33, %arg9 = %32, %arg10 = %33) -> (vector<1x1x1xi32>, vector<1x1x1xi32>, vector<1x1x1xi32>, vector<1x1x1xi32>)  : i32 {
      %99 = arith.andi %arg7, %arg8 : vector<1x1x1xi32>
      %100 = arith.xori %arg7, %arg8 : vector<1x1x1xi32>
      %c1_i32_41 = arith.constant 1 : i32
      %101 = vector.broadcast %c1_i32_41 : i32 to vector<1x1x1xi32>
      %102 = arith.shrsi %100, %101 : vector<1x1x1xi32>
      %103 = arith.addi %99, %102 : vector<1x1x1xi32>
      %104 = arith.andi %arg9, %arg10 : vector<1x1x1xi32>
      %105 = arith.xori %arg9, %arg10 : vector<1x1x1xi32>
      %c1_i32_42 = arith.constant 1 : i32
      %106 = vector.broadcast %c1_i32_42 : i32 to vector<1x1x1xi32>
      %107 = arith.shrsi %105, %106 : vector<1x1x1xi32>
      %108 = arith.addi %104, %107 : vector<1x1x1xi32>
      %109 = vector.broadcast %103 : vector<1x1x1xi32> to vector<1x8x128xi32>
      %110 = arith.cmpi sle, %21, %109 : vector<1x8x128xi32>
      %cst_43 = arith.constant 1.000000e+00 : f32
      %cst_44 = arith.constant 0.000000e+00 : f32
      %111 = vector.broadcast %cst_43 : f32 to vector<1x8x128xf32>
      %112 = vector.broadcast %cst_44 : f32 to vector<1x8x128xf32>
      %113 = arith.select %110, %111, %112 : vector<1x8x128xi1>, vector<1x8x128xf32>
      %cst_45 = arith.constant dense<0.000000e+00> : vector<1xf32>
      %114 = vector.multi_reduction <add>, %113, %cst_45 [1, 2] : vector<1x8x128xf32> to vector<1xf32>
      %115 = vector.shape_cast %114 : vector<1xf32> to vector<1x1x1xf32>
      %116 = vector.broadcast %108 : vector<1x1x1xi32> to vector<1x8x128xi32>
      %117 = arith.cmpi sle, %31, %116 : vector<1x8x128xi32>
      %cst_46 = arith.constant 1.000000e+00 : f32
      %cst_47 = arith.constant 0.000000e+00 : f32
      %118 = vector.broadcast %cst_46 : f32 to vector<1x8x128xf32>
      %119 = vector.broadcast %cst_47 : f32 to vector<1x8x128xf32>
      %120 = arith.select %117, %118, %119 : vector<1x8x128xi1>, vector<1x8x128xf32>
      %cst_48 = arith.constant dense<0.000000e+00> : vector<1xf32>
      %121 = vector.multi_reduction <add>, %120, %cst_48 [1, 2] : vector<1x8x128xf32> to vector<1xf32>
      %122 = vector.shape_cast %121 : vector<1xf32> to vector<1x1x1xf32>
      %123 = arith.cmpf oge, %115, %11 : vector<1x1x1xf32>
      %124 = arith.cmpf oge, %122, %11 : vector<1x1x1xf32>
      %125 = arith.select %123, %103, %arg8 : vector<1x1x1xi1>, vector<1x1x1xi32>
      %c1_i32_49 = arith.constant 1 : i32
      %126 = vector.broadcast %c1_i32_49 : i32 to vector<1x1x1xi32>
      %127 = arith.addi %103, %126 : vector<1x1x1xi32>
      %128 = arith.select %123, %arg7, %127 : vector<1x1x1xi1>, vector<1x1x1xi32>
      %129 = arith.select %124, %108, %arg10 : vector<1x1x1xi1>, vector<1x1x1xi32>
      %c1_i32_50 = arith.constant 1 : i32
      %130 = vector.broadcast %c1_i32_50 : i32 to vector<1x1x1xi32>
      %131 = arith.addi %108, %130 : vector<1x1x1xi32>
      %132 = arith.select %124, %arg9, %131 : vector<1x1x1xi1>, vector<1x1x1xi32>
      scf.yield %128, %125, %132, %129 : vector<1x1x1xi32>, vector<1x1x1xi32>, vector<1x1x1xi32>, vector<1x1x1xi32>
    }
    %cst_19 = arith.constant 0.000000e+00 : f32
    %36 = vector.broadcast %cst_19 : f32 to vector<1x1x1xf32>
    %37 = arith.cmpf ogt, %4, %36 : vector<1x1x1xf32>
    %c0_i32_20 = arith.constant 0 : i32
    %38 = vector.broadcast %c0_i32_20 : i32 to vector<1x1x1xi32>
    %39 = arith.cmpi sge, %35#1, %38 : vector<1x1x1xi32>
    %c2147483647_i32_21 = arith.constant 2147483647 : i32
    %40 = vector.broadcast %c2147483647_i32_21 : i32 to vector<1x1x1xi32>
    %41 = arith.xori %35#1, %40 : vector<1x1x1xi32>
    %42 = arith.select %39, %35#1, %41 : vector<1x1x1xi1>, vector<1x1x1xi32>
    %43 = tpu.bitcast %42 : vector<1x1x1xi32> -> vector<1x1x1xf32>
    %cst_22 = arith.constant 0.000000e+00 : f32
    %44 = vector.broadcast %cst_22 : f32 to vector<1x1x1xf32>
    %45 = arith.select %37, %43, %44 : vector<1x1x1xi1>, vector<1x1x1xf32>
    %c0_i32_23 = arith.constant 0 : i32
    %46 = vector.broadcast %c0_i32_23 : i32 to vector<1x1x1xi32>
    %47 = arith.cmpi sge, %35#3, %46 : vector<1x1x1xi32>
    %c2147483647_i32_24 = arith.constant 2147483647 : i32
    %48 = vector.broadcast %c2147483647_i32_24 : i32 to vector<1x1x1xi32>
    %49 = arith.xori %35#3, %48 : vector<1x1x1xi32>
    %50 = arith.select %47, %35#3, %49 : vector<1x1x1xi1>, vector<1x1x1xi32>
    %51 = tpu.bitcast %50 : vector<1x1x1xi32> -> vector<1x1x1xf32>
    %cst_25 = arith.constant 0.000000e+00 : f32
    %52 = vector.broadcast %cst_25 : f32 to vector<1x1x1xf32>
    %53 = arith.select %37, %51, %52 : vector<1x1x1xi1>, vector<1x1x1xf32>
    %54 = vector.broadcast %45 : vector<1x1x1xf32> to vector<1x8x128xf32>
    %55 = arith.subf %0, %54 : vector<1x8x128xf32>
    %56 = math.absf %55 : vector<1x8x128xf32>
    %57 = arith.mulf %56, %2 : vector<1x8x128xf32>
    %cst_26 = arith.constant dense<0.000000e+00> : vector<1xf32>
    %58 = vector.multi_reduction <add>, %57, %cst_26 [1, 2] : vector<1x8x128xf32> to vector<1xf32>
    %59 = vector.shape_cast %58 : vector<1xf32> to vector<1x1x1xf32>
    %cst_27 = arith.constant 1.000000e+00 : f32
    %60 = vector.broadcast %cst_27 : f32 to vector<1x1x1xf32>
    %61 = arith.addf %4, %60 : vector<1x1x1xf32>
    %62 = arith.divf %59, %61 : vector<1x1x1xf32>
    %63 = vector.broadcast %53 : vector<1x1x1xf32> to vector<1x8x128xf32>
    %64 = arith.subf %1, %63 : vector<1x8x128xf32>
    %65 = math.absf %64 : vector<1x8x128xf32>
    %66 = arith.mulf %65, %2 : vector<1x8x128xf32>
    %cst_28 = arith.constant dense<0.000000e+00> : vector<1xf32>
    %67 = vector.multi_reduction <add>, %66, %cst_28 [1, 2] : vector<1x8x128xf32> to vector<1xf32>
    %68 = vector.shape_cast %67 : vector<1xf32> to vector<1x1x1xf32>
    %cst_29 = arith.constant 1.000000e+00 : f32
    %69 = vector.broadcast %cst_29 : f32 to vector<1x1x1xf32>
    %70 = arith.addf %4, %69 : vector<1x1x1xf32>
    %71 = arith.divf %68, %70 : vector<1x1x1xf32>
    %cst_30 = arith.constant 9.99999997E-7 : f32
    %72 = vector.broadcast %cst_30 : f32 to vector<1x1x1xf32>
    %73 = arith.addf %62, %72 : vector<1x1x1xf32>
    %cst_31 = arith.constant 1.000000e+00 : f32
    %74 = vector.broadcast %cst_31 : f32 to vector<1x1x1xf32>
    %75 = arith.divf %74, %73 : vector<1x1x1xf32>
    %cst_32 = arith.constant 9.99999997E-7 : f32
    %76 = vector.broadcast %cst_32 : f32 to vector<1x1x1xf32>
    %77 = arith.addf %71, %76 : vector<1x1x1xf32>
    %cst_33 = arith.constant 1.000000e+00 : f32
    %78 = vector.broadcast %cst_33 : f32 to vector<1x1x1xf32>
    %79 = arith.divf %78, %77 : vector<1x1x1xf32>
    %80 = vector.broadcast %45 : vector<1x1x1xf32> to vector<1x8x128xf32>
    %81 = arith.subf %0, %80 : vector<1x8x128xf32>
    %82 = vector.broadcast %75 : vector<1x1x1xf32> to vector<1x8x128xf32>
    %83 = arith.mulf %81, %82 : vector<1x8x128xf32>
    %84 = vector.broadcast %53 : vector<1x1x1xf32> to vector<1x8x128xf32>
    %85 = arith.subf %1, %84 : vector<1x8x128xf32>
    %86 = vector.broadcast %79 : vector<1x1x1xf32> to vector<1x8x128xf32>
    %87 = arith.mulf %85, %86 : vector<1x8x128xf32>
    %88 = arith.subf %83, %87 : vector<1x8x128xf32>
    %89 = math.absf %88 : vector<1x8x128xf32>
    %90 = arith.mulf %89, %2 : vector<1x8x128xf32>
    %cst_34 = arith.constant dense<0.000000e+00> : vector<1xf32>
    %91 = vector.multi_reduction <add>, %90, %cst_34 [1, 2] : vector<1x8x128xf32> to vector<1xf32>
    %92 = vector.shape_cast %91 : vector<1xf32> to vector<1x1x1xf32>
    %93 = vector.shape_cast %92 : vector<1x1x1xf32> to vector<1x1x1xf32>
    %94 = vector.broadcast %93 : vector<1x1x1xf32> to vector<1x1x128xf32>
    %c0_35 = arith.constant 0 : index
    %c0_36 = arith.constant 0 : index
    %c0_37 = arith.constant 0 : index
    %95 = vector.load %arg4[%c0_35, %c0_36, %c0_37] : memref<1x1x128xf32, #tpu.memory_space<vmem>>, vector<1x1x128xf32>
    tpu.vector_store %arg4[%c0_35, %c0_36, %c0_37], %94 {strides = array<i32>} : memref<1x1x128xf32, #tpu.memory_space<vmem>>, vector<1x1x128xf32>,
    %96 = vector.shape_cast %4 : vector<1x1x1xf32> to vector<1x1x1xf32>
    %97 = vector.broadcast %96 : vector<1x1x1xf32> to vector<1x1x128xf32>
    %c0_38 = arith.constant 0 : index
    %c0_39 = arith.constant 0 : index
    %c0_40 = arith.constant 0 : index
    %98 = vector.load %arg5[%c0_38, %c0_39, %c0_40] : memref<1x1x128xf32, #tpu.memory_space<vmem>>, vector<1x1x128xf32>
    tpu.vector_store %arg5[%c0_38, %c0_39, %c0_40], %97 {strides = array<i32>} : memref<1x1x128xf32, #tpu.memory_space<vmem>>, vector<1x1x128xf32>,
    return
  }
  func.func @transform_0(%arg0: i32) -> (i32, i32, i32) {
    %c0_i32 = arith.constant 0 : i32
    %c0_i32_0 = arith.constant 0 : i32
    %c0_i32_1 = arith.constant 0 : i32
    return %arg0, %c0_i32, %c0_i32_0 : i32, i32, i32
  }
  func.func @transform_1(%arg0: i32) -> (i32, i32, i32) {
    %c0_i32 = arith.constant 0 : i32
    %c0_i32_0 = arith.constant 0 : i32
    %c0_i32_1 = arith.constant 0 : i32
    return %arg0, %c0_i32, %c0_i32_0 : i32, i32, i32
  }
  func.func @transform_2(%arg0: i32) -> (i32, i32, i32) {
    %c0_i32 = arith.constant 0 : i32
    %c0_i32_0 = arith.constant 0 : i32
    %c0_i32_1 = arith.constant 0 : i32
    return %arg0, %c0_i32, %c0_i32_0 : i32, i32, i32
  }
  func.func @transform_3(%arg0: i32) -> (i32, i32, i32) {
    %c0_i32 = arith.constant 0 : i32
    %c0_i32_0 = arith.constant 0 : i32
    %c0_i32_1 = arith.constant 0 : i32
    return %arg0, %c0_i32, %c0_i32_0 : i32, i32, i32
  }
  func.func @transform_4(%arg0: i32) -> (i32, i32, i32) {
    %c0_i32 = arith.constant 0 : i32
    %c0_i32_0 = arith.constant 0 : i32
    %c0_i32_1 = arith.constant 0 : i32
    return %arg0, %c0_i32, %c0_i32_0 : i32, i32, i32
  }
}

</mosaic_0001>

<bundles_post_ra>
// kernel: tpu_custom_call.1
= control target key start
LH: loop header
LB: loop body
LE: loop exit
PB: predicated region body
PF: predicated region fallthrough
CT: control target
= control target key end

     0   :  { %s1288_s0 = inlined_call_operand.hbm [shape: f32[2,8,128], index: 0, kind: input, shape index: {}]   ;;  %s1289_s1 = inlined_call_operand.hbm [shape: f32[2,8,128], index: 1, kind: input, shape index: {}]   ;;  %s1290_s2 = inlined_call_operand.hbm [shape: f32[2,8,128], index: 2, kind: input, shape index: {}]   ;;  %s1291_s3 = inlined_call_operand.hbm [shape: f32[2,1,128], index: 3, kind: output, shape index: {0}]   ;;  %s1292_s4 = inlined_call_operand.hbm [shape: f32[2,1,128], index: 4, kind: output, shape index: {1}]  }
   0x1   :  { %1294 = sst [smem:[#allocation17_spill]] %s1289_s1 }
   0x2   :  { %10 = vsyncpa [#allocation3], 0 }
   0x3   :  { %12 = vsyncpa [#allocation3 + $0x1], 0 }
   0x4   :  { %13 = vsyncpa [#allocation6], 0 }
   0x5   :  { %15 = vsyncpa [#allocation6 + $0x1], 0 }
   0x6   :  { %16 = vsyncpa [#allocation4], 0 }
   0x7   :  { %18 = vsyncpa [#allocation4 + $0x1], 0 }
   0x8   :  { %19 = vsyncpa [#allocation10], 0 }
   0x9   :  { %21 = vsyncpa [#allocation10 + $0x1], 0  ;;  %s1036_s15 = smov 0   ;;  %s1038_s16 = smov 0  }
   0xa   :  { %s1040_s17 = smov 0   ;;  %s1042_s18 = smov 0  }
   0xb LB: > { %1295 = sst [smem:[#allocation15_spill]] %s984_s17  ;;  %s1057_s19 = sadd.s32 4294967295, %s988_s18   ;;  %s988_s18 = sphi %s1042_s18, %s1307_s18   ;;  %s984_s17 = sphi %s1040_s17, %s1304_s17   ;;  %s980_s16 = sphi %s1038_s16, %s1306_s16   ;;  %s976_s15 = sphi %s1036_s15, %s1305_s15  }
   0xc   : > { %s652_s20 = sadd.s32 4294967294, %s988_s18   ;;  %s1061_s21 = sadd.s32 1, %s988_s18  }
   0xd   : > { %s34_s22 = sadd.s32 1, %s984_s17  ;;  %s31_s23 = ssub.s32 %s988_s18, %s1061_s21 }
   0xe   : > { %p41_p0 = scmp.ne.s32.totalorder %s984_s17, %s980_s16  ;;  %p32_p1 = scmp.eq.s32.totalorder %s31_s23, 0 }
   0xf   : > { %p42_p2 = scmp.eq.s32.totalorder %s988_s18, 0  ;;  %p47_p3 = scmp.ne.s32.totalorder %s980_s16, %s976_s15 }
  0x10   : > { %p48_p4 = scmp.eq.s32.totalorder %s1057_s19, 0  ;;  %p123_p7 = scmp.eq.s32.totalorder %s1057_s19, 1 }
  0x11   : > { %s1073_s24 = scalar_select %p32_p1, %s984_s17, %s34_s22  }
  0x12   : > { %p43_p5 = por %p42_p2, %p41_p0  ;;  %p1075_p6 = por %p48_p4, %p47_p3 }
  0x13   : > { %1296 = sst [smem:[#allocation16_spill]] %s1073_s24  ;;  %p129_p8 = scmp.eq.s32.totalorder %s652_s20, 1 }
  0x14   : > { %p654_p9 = scmp.ge.s32.totalorder %s988_s18, 2  ;;  %p695_p10 = scmp.lt.s32.totalorder %s988_s18, 2 }
  0x15   : > { %p1082_p11 = por %p123_p7, %p41_p0  ;;  %p1086_p12 = por %p129_p8, %p47_p3 }
  0x16   : > { %s175_s28 = sand.u32 1, %s984_s17   ;;  %s1092_s29 = sshll.u32 %s988_s18, 3 }
  0x17   : > { %s1096_s30 = sshll.u32 %s175_s28, 3  ;;  %p1098_p13 = pnand %p695_p10, %p43_p5 }
  0x18   : > { %s194_s6 = sand.u32 1, %s988_s18   ;;  %s1301_s1 = sld [smem:[#allocation17_spill]] }
  0x19   : > { %s198_s10 = scalar_lea.vmem [#allocation5], %s1096_s30  ;;  %p661_p0 = scmp.ge.s32.totalorder %s988_s18, 1 }
  0x1a   : > { %s206_s11 = sshll.u32 %s198_s10, 4  ;;  %s1109_s13 = scalar_lea.sflag [#allocation6], %s194_s6  ;;  %s207_s11 = int_to_ptr.vmem [resolvable:$true] %s206_s11 }
  0x1b   : > { %p780_p2 = pneg %p1098_p13 }
  0x1e   : > { %s202_s9 = scalar_lea.hbm %s1301_s1, %s1092_s29  ;;  %s783_s7 = scalar_lea.hbm %s1301_s1, 16 }
  0x1f   : > { %s204_s12 = sshll.u32 %s202_s9, 4  ;;  %s205_s12 = int_to_ptr.hbm [resolvable:$true] %s204_s12 }
  0x20   : > { %s776_s14 = sshra.s32 %s205_s12, 4  ;;  %s777_s14 = int_to_ptr.hbm [resolvable:$true] %s776_s14 }
  0x21   : > { %s778_s20 = scalar_lea.hbm %s777_s14, 8  ;;  %p784_p5 = scmp.lt.s32.totalorder %s777_s14, %s1301_s1 }
  0x22   : > { %p779_p1 = scmp.ne.s32.totalorder %s777_s14, %s778_s20  ;;  %p785_p7 = scmp.lt.s32.totalorder %s783_s7, %s778_s20 }
  0x24   : > { %p781_p3 = pnand %p780_p2, %p779_p1  ;;  %p786_p8 = por %p785_p7, %p784_p5 }
  0x26   : > { %p782_p4 = pneg %p781_p3 }
  0x28   : > { %p787_p10 = pnand %p786_p8, %p782_p4 }
  0x2a   : > { %790 = shalt.err (!%p787_p10)
}
  0x2b   : > { %684 = dma.hbm_to_vmem [thread:$0]  (!%p1098_p13), %s205_s12, 128, %s207_s11, %s1109_s13  }
  0x2c   : > { %p230_p1 = scmp.lt.s32.totalorder %s988_s18, 3  ;;  %s183_s22 = scalar_lea.hbm %s1288_s0, %s1092_s29 }
  0x2d   : > { %s185_s20 = sshll.u32 %s183_s22, 4  ;;  %s179_s23 = scalar_lea.vmem [#allocation2], %s1096_s30  ;;  %s186_s20 = int_to_ptr.hbm [resolvable:$true] %s185_s20 }
  0x2e   : > { %p1132_p3 = pnand %p661_p0, %p230_p1  ;;  %s187_s7 = sshll.u32 %s179_s23, 4  ;;  %s188_s7 = int_to_ptr.vmem [resolvable:$true] %s187_s7 }
  0x2f   : > { %s176_s8 = scalar_lea.sflag [#allocation3], %s175_s28  ;;  %s806_s9 = sshra.s32 %s186_s20, 4  ;;  %s807_s9 = int_to_ptr.hbm [resolvable:$true] %s806_s9 }
  0x30   : > { %s808_s11 = scalar_lea.hbm %s807_s9, 8  ;;  %s813_s10 = scalar_lea.hbm %s1288_s0, 16 }
  0x31   : > { %p809_p4 = scmp.ne.s32.totalorder %s807_s9, %s808_s11  ;;  %p814_p0 = scmp.lt.s32.totalorder %s807_s9, %s1288_s0 }
  0x32   : > { %p815_p8 = scmp.lt.s32.totalorder %s813_s10, %s808_s11 }
  0x33   : > { %p811_p5 = pnand %p809_p4, %p780_p2 }
  0x34   : > { %p816_p10 = por %p815_p8, %p814_p0 }
  0x35   : > { %p812_p7 = pneg %p811_p5 }
  0x37   : > { %p817_p1 = pnand %p816_p10, %p812_p7 }
  0x39   : > { %820 = shalt.err (!%p817_p1)
}
  0x3a   : > { %681 = dma.hbm_to_vmem [thread:$0]  (!%p1098_p13), %s186_s20, 128, %s188_s7, %s176_s8  }
  0x3b   : > { %s221_s24 = scalar_lea.hbm %s1290_s2, %s1092_s29  ;;  %s217_s12 = scalar_lea.vmem [#allocation7], %s1096_s30 }
  0x3c   : > { %s225_s6 = sshll.u32 %s217_s12, 4  ;;  %s223_s17 = sshll.u32 %s221_s24, 4  ;;  %s226_s6 = int_to_ptr.vmem [resolvable:$true] %s225_s6  ;;  %s224_s17 = int_to_ptr.hbm [resolvable:$true] %s223_s17 }
  0x3d   : > { %s836_s1 = sshra.s32 %s224_s17, 4  ;;  %s843_s20 = scalar_lea.hbm %s1290_s2, 16  ;;  %s837_s1 = int_to_ptr.hbm [resolvable:$true] %s836_s1 }
  0x3e   : > { %s838_s9 = scalar_lea.hbm %s837_s1, 8  ;;  %p844_p0 = scmp.lt.s32.totalorder %s837_s1, %s1290_s2 }
  0x3f   : > { %p839_p4 = scmp.ne.s32.totalorder %s837_s1, %s838_s9  ;;  %p845_p8 = scmp.lt.s32.totalorder %s843_s20, %s838_s9 }
  0x41   : > { %p841_p5 = pnand %p839_p4, %p780_p2  ;;  %p846_p10 = por %p845_p8, %p844_p0 }
  0x43   : > { %p842_p7 = pneg %p841_p5 }
  0x45   : > { %p847_p1 = pnand %p846_p10, %p842_p7 }
  0x47   : > { %850 = shalt.err (!%p847_p1)
}
  0x48   : > { %687 = dma.hbm_to_vmem [thread:$0]  (!%p1098_p13), %s224_s17, 128, %s226_s6, %s1109_s13  }
  0x49   : > { %234 = sbr.rel (%p1132_p3) target bundleno = 663 (0x297), region = 32  ;;  %s1170_s24 = sand.u32 (!%p1132_p3), 1, %s980_s16  }
  0x4a   : > { %s662_s29 = sshll.u32 (!%p1132_p3), %s1170_s24, 3  ;;  %s237_s30 = scalar_lea.sflag (!%p1132_p3), [#allocation3], %s1170_s24 }
  0x4b   : > { %s240_s22 = scalar_lea.vmem (!%p1132_p3), [#allocation2], %s662_s29 }
  0x4e   : > { %959 = dma.done.wait (%p1075_p6), %s237_s30, 128  }
  0x4f   : > { %961 = vsyncadd (%p1075_p6), %s237_s30, 4294967168  ;;  %s246_s17 = sand.u32 1, %s1057_s19   ;;  %s250_s13 = scalar_lea.vmem [#allocation5], %s662_s29 }
  0x50   : > { %s247_s5 = scalar_lea.sflag [#allocation6], %s246_s17 }
  0x51   : > { %963 = dma.done.wait (%p1075_p6), %s247_s5, 256  }
  0x52   : > { %965 = vsyncadd (%p1075_p6), %s247_s5, 4294967040  ;;  %v1183_v0 = vld [vmem:[%s240_s22] sm:$0xff]  ;;  %v1185_v1 = vld [vmem:[%s250_s13] sm:$0xff]  ;;  %s260_s14 = scalar_lea.vmem [#allocation7], %s662_s29  ;;  %s292_s25 = scalar_lea.vmem [#allocation8], %s1170_s24  ;;  %v994_v21 = vmov 2147483648  }
  0x53   : > { %v1187_v2 = vld [vmem:[%s260_s14] sm:$0xff]  ;;  %vm315_vm0 = vcmp.ge.s32.totalorder %v1183_v0, 0  ;;  %v316_v3 = vxor.u32 2147483647, %v1183_v0  ;;  %vm321_vm2 = vcmp.ge.s32.totalorder %v1185_v1, 0  ;;  %s298_s28 = scalar_lea.vmem [#allocation9], %s1170_s24 }
  0x54   : > { %302 = vadd.xlane.f32.xlu0 %v1187_v2  ;;  %vm318_vm1 = vcmp.gt.f32.partialorder %v1187_v2, 0.0  ;;  %v322_v4 = vxor.u32 2147483647, %v1185_v1  ;;  %v990_v20 = vmov 2147483647   ;;  %v1002_v23 = vmov 2147483648  }
  0x55   : > { %v317_v5 = vsel %vm315_vm0, %v1183_v0, %v316_v3  ;;  %v998_v22 = vmov 2147483647   ;;  %s1206_s23 = smov 0  }
  0x56   : > { %v1196_v6 = vsel %vm318_vm1, %v317_v5, 2147483647  ;;  %v323_v7 = vsel %vm321_vm2, %v1185_v1, %v322_v4 }
  0x57   : > { %v1199_v8 = vsel %vm318_vm1, %v323_v7, 2147483647 }
  0xc7   : > { %v303_v9 = vpop.xlane.xlu0 %302 }
  0xc8   : > { %v304_v10 = vrot.slane %v303_v9, 4 }
  0xca   : > { %v305_v11 = vadd.f32 %v304_v10, %v303_v9 }
  0xcc   : > { %v306_v12 = vrot.slane %v305_v11, 2 }
  0xce   : > { %v307_v13 = vadd.f32 %v306_v12, %v305_v11 }
  0xd0   : > { %v308_v14 = vrot.slane %v307_v13, 1 }
  0xd2   : > { %v1201_v15 = vadd.f32 %v308_v14, %v307_v13 }
  0xd4   : > { %v665_v16 = vadd.f32 -1.0, %v1201_v15 }
  0xd6   : > { %v311_v17 = vmul.f32 0.5, %v665_v16 }
  0xd8   : > { %v312_v18 = vfloor.f32 %v311_v17 }
  0xda   : > { %v313_v19 = vadd.f32 1.0, %v312_v18 }
  0xdb LB: >> { %v335_v24 = vand.u32 %v1000_v22, %v1004_v23  ;;  %v336_v25 = vxor.u32 %v1000_v22, %v1004_v23  ;;  %v340_v26 = vxor.u32 %v992_v20, %v996_v21  ;;  %v339_v28 = vand.u32 %v992_v20, %v996_v21  ;;  %s330_s23 = sadd.s32 1, %s1008_s23   ;;  %s1008_s23 = sphi %s1206_s23, %s330_s23   ;;  %v1004_v23 = vphi %v1002_v23, %v367_v23   ;;  %v1000_v22 = vphi %v998_v22, %v999_v22   ;;  %v996_v21 = vphi %v994_v21, %v370_v21   ;;  %v992_v20 = vphi %v990_v20, %v991_v20  }
  0xdc   : >> { %v1010_v32 = vmov 0.0   ;;  %p327_p6 = scmp.ge.s32.totalorder %s330_s23, 32  }
  0xdd   : >> { %v337_v27 = vshra.s32 %v336_v25, 1  ;;  %v341_v29 = vshra.s32 %v340_v26, 1  ;;  %vm371_vm7 = vcmp.gt.f32.partialorder (%p327_p6), %v1201_v15, 0.0  ;;  %467 = vst [vmem:[%s298_s28] sm:$0x1] (%p327_p6), %v1201_v15  ;;  %v393_v4 = vadd.f32 (%p327_p6), 1.0, %v1201_v15  ;;  %s494_s1 = scalar_lea.hbm (%p327_p6), %s1292_s4, %s1057_s19  ;;  %s496_s9 = sshll.u32 (%p327_p6), %s298_s28, 4  ;;  %s497_s9 = int_to_ptr.vmem [resolvable:$true] %s496_s9 }
  0xde   : > { %s498_s11 = sshll.u32 (%p327_p6), %s494_s1, 4  ;;  %s473_s10 = scalar_lea.sflag (%p327_p6), [#allocation10], %s1170_s24  ;;  %s499_s11 = int_to_ptr.hbm [resolvable:$true] %s498_s11 }
  0xdf   : >> { %v338_v30 = vadd.s32 %v337_v27, %v335_v24  ;;  %v342_v31 = vadd.s32 %v341_v29, %v339_v28  ;;  %770 = vrcp.f32 (%p327_p6), %v393_v4  ;;  %vm399_vm10 = vweird.f32 (%p327_p6), %v393_v4  ;;  %s880_s20 = sshra.s32 (%p327_p6), %s499_s11, 4  ;;  %s886_s30 = scalar_lea.hbm (%p327_p6), %s1292_s4, 2  ;;  %s881_s20 = int_to_ptr.hbm [resolvable:$true] %s880_s20 }
  0xe0   : > { %v403_v12 = vand.u32 (%p327_p6), 2147483647, %v393_v4  ;;  %s882_s7 = scalar_lea.hbm (%p327_p6), %s881_s20, 1  ;;  %p887_p4 = scmp.lt.s32.totalorder (%p327_p6), %s881_s20, %s1292_s4 }
  0xe1   : >> { %vm343_vm3 = vcmp.le.s32.totalorder %v1196_v6, %v338_v30  ;;  %vm353_vm4 = vcmp.le.s32.totalorder %v1199_v8, %v342_v31  ;;  %v366_v43 = vadd.s32 1, %v338_v30  ;;  %v369_v50 = vadd.s32 1, %v342_v31  ;;  %p883_p13 = scmp.ne.s32.totalorder (%p327_p6), %s881_s20, %s882_s7  ;;  %p888_p5 = scmp.lt.s32.totalorder (%p327_p6), %s886_s30, %s882_s7 }
  0xe2   : >> { %v344_v33 = vsel %vm343_vm3, 1.0, %v1010_v32  ;;  %v354_v34 = vsel %vm353_vm4, 1.0, %v1010_v32  ;;  %vm404_vm13 = vcmp.eq.f32.partialorder (%p327_p6), %v403_v12, 8.507059e+37 }
  0xe3   : >> { %345 = vadd.xlane.f32.xlu0 %v344_v33  ;;  %p884_p2 = pnand (%p327_p6), %p883_p13, %p1082_p11  ;;  %p889_p7 = por (%p327_p6), %p888_p5, %p887_p4 }
  0xe5   : > { %v771_v5 = vpop.eup (%p327_p6), %770  ;;  %p885_p3 = pneg (%p327_p6), %p884_p2 }
  0xe6   : > { %vm400_vm11 = vweird.f32 (%p327_p6), %v771_v5 }
  0xe7   : > { %vm401_vm12 = vmor (%p327_p6), %vm399_vm10, %vm400_vm11  ;;  %p890_p0 = pnand (%p327_p6), %p889_p7, %p885_p3 }
  0xeb   : >> { %355 = vadd.xlane.f32.xlu0 %v354_v34 }
 0x156   : >> { %v346_v35 = vpop.xlane.xlu0 %345 }
 0x157   : >> { %v347_v36 = vrot.slane %v346_v35, 4 }
 0x159   : >> { %v348_v37 = vadd.f32 %v347_v36, %v346_v35 }
 0x15b   : >> { %v349_v38 = vrot.slane %v348_v37, 2 }
 0x15d   : >> { %v350_v39 = vadd.f32 %v349_v38, %v348_v37 }
 0x15e   : >> { %v356_v40 = vpop.xlane.xlu0 %355 }
 0x15f   : >> { %v351_v41 = vrot.slane %v350_v39, 1  ;;  %v357_v42 = vrot.slane %v356_v40, 4 }
 0x161   : >> { %v352_v44 = vadd.f32 %v351_v41, %v350_v39  ;;  %v358_v45 = vadd.f32 %v357_v42, %v356_v40 }
 0x163   : >> { %vm363_vm5 = vcmp.ge.f32.partialorder %v352_v44, %v313_v19  ;;  %v359_v46 = vrot.slane %v358_v45, 2 }
 0x164   : >> { %v365_v47 = vsel %vm363_vm5, %v338_v30, %v1000_v22   ;;  %v367_v23 = vsel %vm363_vm5, %v1004_v23, %v366_v43  }
 0x165   : >> { %v360_v48 = vadd.f32 %v359_v46, %v358_v45  ;;  %v999_v22 = vmov %v365_v47   ;;  %vm372_vm8 = vcmp.ge.s32.totalorder (%p327_p6), %v365_v47, 0  ;;  %v373_v53 = vxor.u32 (%p327_p6), 2147483647, %v365_v47 }
 0x167   : >> { %v361_v49 = vrot.slane %v360_v48, 1  ;;  %v374_v55 = vsel (%p327_p6), %vm372_vm8, %v365_v47, %v373_v53 }
 0x168   : > { %v376_v56 = vsel (%p327_p6), %vm371_vm7, %v374_v55, 0.0 }
 0x169   : >> { %v362_v51 = vadd.f32 %v361_v49, %v360_v48  ;;  %329 = sbr.rel (!%p327_p6) target bundleno = 219 (0xdb), region = 125  ;;  %v1221_v58 = vsub.f32 (%p327_p6), %v1183_v0, %v376_v56  ;;  %v395_v0 = vmul.f32 (%p327_p6), %v771_v5, %v393_v4 }
 0x16b   : >> { %vm364_vm6 = vcmp.ge.f32.partialorder %v362_v51, %v313_v19  ;;  %v383_v60 = vand.u32 (%p327_p6), 2147483647, %v1221_v58  ;;  %v396_v6 = vsub.f32 (%p327_p6), 1.0, %v395_v0 }
 0x16c   : >> { %v368_v52 = vsel %vm364_vm6, %v342_v31, %v992_v20   ;;  %v370_v21 = vsel %vm364_vm6, %v996_v21, %v369_v50  }
 0x16d   : >> { %v991_v20 = vmov %v368_v52   ;;  %vm377_vm9 = vcmp.ge.s32.totalorder (%p327_p6), %v368_v52, 0  ;;  %v378_v54 = vxor.u32 (%p327_p6), 2147483647, %v368_v52  ;;  %v384_v62 = vmul.f32 (%p327_p6), %v383_v60, %v1187_v2 }
 0x16e   : > { %v397_v7 = vmul.f32 %v771_v5, %v396_v6 }
 0x16f   : > { %v379_v57 = vsel %vm377_vm9, %v368_v52, %v378_v54  ;;  %385 = vadd.xlane.f32.xlu0 %v384_v62 }
 0x170   : > { %v381_v59 = vsel %vm371_vm7, %v379_v57, 0.0  ;;  %v398_v11 = vadd.f32 %v771_v5, %v397_v7 }
 0x171   : > { %v1225_v61 = vsub.f32 %v1185_v1, %v381_v59  ;;  %v405_v1 = vand.u32 2147483648, %v393_v4 }
 0x172   : > { %v402_v17 = vsel %vm401_vm12, %v771_v5, %v398_v11 }
 0x173   : > { %v410_v63 = vand.u32 2147483647, %v1225_v61  ;;  %v406_v14 = vor.u32 1.1754944e-38, %v405_v1 }
 0x175   : > { %v411_v3 = vmul.f32 %v410_v63, %v1187_v2  ;;  %v407_v20 = vsel %vm404_vm13, %v406_v14, %v402_v17 }
 0x177   : > { %412 = vadd.xlane.f32.xlu0 %v411_v3 }
 0x1e2   : > { %v386_v8 = vpop.xlane.xlu0 %385 }
 0x1e3   : > { %v387_v9 = vrot.slane %v386_v8, 4 }
 0x1e5   : > { %v388_v10 = vadd.f32 %v387_v9, %v386_v8 }
 0x1e7   : > { %v389_v13 = vrot.slane %v388_v10, 2 }
 0x1e9   : > { %v390_v16 = vadd.f32 %v389_v13, %v388_v10 }
 0x1ea   : > { %v413_v15 = vpop.xlane.xlu0 %412 }
 0x1eb   : > { %v391_v18 = vrot.slane %v390_v16, 1  ;;  %v414_v19 = vrot.slane %v413_v15, 4 }
 0x1ed   : > { %v392_v21 = vadd.f32 %v391_v18, %v390_v16  ;;  %v415_v22 = vadd.f32 %v414_v19, %v413_v15 }
 0x1ef   : > { %v408_v23 = vmul.f32 %v407_v20, %v392_v21  ;;  %v416_v24 = vrot.slane %v415_v22, 2 }
 0x1f1   : > { %v421_v25 = vadd.f32 1e-06, %v408_v23  ;;  %v417_v26 = vadd.f32 %v416_v24, %v415_v22 }
 0x1f3   : > { %772 = vrcp.f32 %v421_v25  ;;  %v418_v27 = vrot.slane %v417_v26, 1  ;;  %v433_v38 = vand.u32 2147483648, %v421_v25  ;;  %vm427_vm15 = vweird.f32 %v421_v25 }
 0x1f4   : > { %v431_v39 = vand.u32 2147483647, %v421_v25 }
 0x1f5   : > { %v419_v28 = vadd.f32 %v418_v27, %v417_v26  ;;  %v434_v45 = vor.u32 1.1754944e-38, %v433_v38 }
 0x1f6   : > { %vm432_vm2 = vcmp.eq.f32.partialorder %v431_v39, 8.507059e+37 }
 0x1f7   : > { %v420_v29 = vmul.f32 %v419_v28, %v407_v20 }
 0x1f9   : > { %v773_v30 = vpop.eup %772  ;;  %v437_v31 = vadd.f32 1e-06, %v420_v29 }
 0x1fa   : > { %v423_v32 = vmul.f32 %v773_v30, %v421_v25  ;;  %vm428_vm14 = vweird.f32 %v773_v30 }
 0x1fb   : > { %774 = vrcp.f32 %v437_v31  ;;  %vm429_vm0 = vmor %vm427_vm15, %vm428_vm14  ;;  %v449_v41 = vand.u32 2147483648, %v437_v31  ;;  %v447_v44 = vand.u32 2147483647, %v437_v31  ;;  %vm443_vm3 = vweird.f32 %v437_v31 }
 0x1fc   : > { %v424_v33 = vsub.f32 1.0, %v423_v32 }
 0x1fd   : > { %v450_v48 = vor.u32 1.1754944e-38, %v449_v41  ;;  %vm448_vm5 = vcmp.eq.f32.partialorder %v447_v44, 8.507059e+37 }
 0x1fe   : > { %v425_v34 = vmul.f32 %v773_v30, %v424_v33 }
 0x200   : > { %v426_v36 = vadd.f32 %v773_v30, %v425_v34 }
 0x201   : > { %v775_v35 = vpop.eup %774 }
 0x202   : > { %v439_v37 = vmul.f32 %v775_v35, %v437_v31  ;;  %v430_v42 = vsel %vm429_vm0, %v773_v30, %v426_v36  ;;  %vm444_vm1 = vweird.f32 %v775_v35 }
 0x203   : > { %v435_v47 = vsel %vm432_vm2, %v434_v45, %v430_v42  ;;  %vm445_vm4 = vmor %vm443_vm3, %vm444_vm1 }
 0x204   : > { %v440_v40 = vsub.f32 1.0, %v439_v37  ;;  %v453_v51 = vmul.f32 %v435_v47, %v1221_v58 }
 0x206   : > { %v441_v43 = vmul.f32 %v775_v35, %v440_v40 }
 0x208   : > { %v442_v46 = vadd.f32 %v775_v35, %v441_v43 }
 0x20a   : > { %v446_v49 = vsel %vm445_vm4, %v775_v35, %v442_v46 }
 0x20b   : > { %v451_v50 = vsel %vm448_vm5, %v450_v48, %v446_v49 }
 0x20c   : > { %v454_v52 = vmul.f32 %v451_v50, %v1225_v61 }
 0x20e   : > { %v455_v53 = vsub.f32 %v453_v51, %v454_v52 }
 0x210   : > { %v456_v54 = vand.u32 2147483647, %v455_v53 }
 0x212   : > { %v457_v55 = vmul.f32 %v456_v54, %v1187_v2 }
 0x214   : > { %458 = vadd.xlane.f32.xlu1 %v457_v55 }
 0x215   : > { %893 = shalt.err (!%p890_p0)
}
 0x216   : > { %675 = dma.vmem_to_hbm [thread:$0]  (%p1082_p11), %s497_s9, 16, %s499_s11, %s473_s10  }
 0x217   : > { %s481_s14 = scalar_lea.hbm %s1291_s3, %s1057_s19  ;;  %s483_s28 = sshll.u32 %s292_s25, 4  ;;  %s484_s28 = int_to_ptr.vmem [resolvable:$true] %s483_s28 }
 0x218   : > { %s485_s23 = sshll.u32 %s481_s14, 4  ;;  %s469_s12 = scalar_lea.sflag [#allocation4], %s1170_s24  ;;  %s486_s23 = int_to_ptr.hbm [resolvable:$true] %s485_s23 }
 0x219   : > { %s908_s6 = sshra.s32 %s486_s23, 4  ;;  %s914_s11 = scalar_lea.hbm %s1291_s3, 2  ;;  %s909_s6 = int_to_ptr.hbm [resolvable:$true] %s908_s6 }
 0x21a   : > { %s910_s1 = scalar_lea.hbm %s909_s6, 1  ;;  %p915_p6 = scmp.lt.s32.totalorder %s909_s6, %s1291_s3 }
 0x21b   : > { %p911_p8 = scmp.ne.s32.totalorder %s909_s6, %s910_s1  ;;  %p916_p13 = scmp.lt.s32.totalorder %s914_s11, %s910_s1 }
 0x21d   : > { %p912_p10 = pnand %p911_p8, %p1082_p11  ;;  %p917_p2 = por %p916_p13, %p915_p6 }
 0x21f   : > { %p913_p1 = pneg %p912_p10 }
 0x221   : > { %p918_p3 = pnand %p917_p2, %p913_p1 }
 0x287   : > { %v459_v2 = vpop.xlane.xlu1 %458 }
 0x288   : > { %v460_v56 = vrot.slane %v459_v2, 4 }
 0x28a   : > { %v461_v57 = vadd.f32 %v460_v56, %v459_v2 }
 0x28c   : > { %v462_v58 = vrot.slane %v461_v57, 2 }
 0x28e   : > { %v463_v59 = vadd.f32 %v462_v58, %v461_v57 }
 0x290   : > { %v464_v60 = vrot.slane %v463_v59, 1 }
 0x292   : > { %v465_v61 = vadd.f32 %v464_v60, %v463_v59 }
 0x294   : > { %466 = vst [vmem:[%s292_s25] sm:$0x1] %v465_v61 }
 0x295   : > { %921 = shalt.err (!%p918_p3)
}
 0x296   : > { %674 = dma.vmem_to_hbm [thread:$0]  (%p1082_p11), %s484_s28, 16, %s486_s23, %s469_s12  }
 0x297 PF: > { %s510_s24 = sand.u32 1, %s976_s15   ;;  %p689_p4 = pnand %p654_p9, %p1086_p12 }
 0x298   : > { %s511_s25 = scalar_lea.sflag [#allocation4], %s510_s24 }
 0x299   : > { %p690_p5 = pneg %p689_p4 }
 0x29b   : > { %967 = dma.done.wait (%p690_p5), %s511_s25, 16  }
 0x29c   : > { %969 = vsyncadd (%p690_p5), %s511_s25, 4294967280  ;;  %s520_s7 = scalar_lea.sflag [#allocation10], %s510_s24 }
 0x29d   : > { %971 = dma.done.wait (%p690_p5), %s520_s7, 16  }
 0x29e   : > { %973 = vsyncadd (%p690_p5), %s520_s7, 4294967280  ;;  %s1303_s8 = sld [smem:[#allocation15_spill]]  ;;  %p24_p11 = scmp.ge.s32.totalorder %s1061_s21, 4  }
 0x29f   : > { %s1304_s17 = sld [smem:[#allocation16_spill]]  ;;  %s1305_s15 = smov %s980_s16 }
 0x2a0   : > { %s1307_s18 = smov %s1061_s21  ;;  %26 = sbr.rel (!%p24_p11) target bundleno = 11 (0xb), region = 136 }
 0x2a4   : > { %s1306_s16 = smov %s1303_s8 }
 0x2a5   :  { %525 = vsyncpa [#allocation3], 1 }
 0x2a6   :  { %527 = vsyncpa [#allocation3 + $0x1], 1 }
 0x2a7   :  { %528 = vsyncpa [#allocation6], 1 }
 0x2a8   :  { %530 = vsyncpa [#allocation6 + $0x1], 1 }
 0x2a9   :  { %531 = vsyncpa [#allocation4], 1 }
 0x2aa   :  { %533 = vsyncpa [#allocation4 + $0x1], 1 }
 0x2ab   :  { %534 = vsyncpa [#allocation10], 1 }
 0x2ac   :  { %536 = vsyncpa [#allocation10 + $0x1], 1 }

</bundles_post_ra>
